<compile_context>
chip_gen: v7x
topology: tpu7x:2x2x1
jax: 0.10.0
libtpu: 0.0.40
codegen_flags: <defaults>
</compile_context>

<pallas_src>
import functools
import math

import jax
import jax.numpy as jnp
from jax.experimental import pallas as pl
from jax.experimental.pallas import tpu as pltpu


def _round_up(n: int, m: int) -> int:
    return ((n + m - 1) // m) * m


def _probe_buffered() -> bool:
    try:
        pl.BlockSpec((8, 128), lambda i: (0, 0), pipeline_mode=pl.Buffered(1))
        return True
    except Exception:
        return False


_HAS_BUFFERED = _probe_buffered()


def _spec(shape, index_map, buffers=None):
    """BlockSpec with an optional explicit buffer count (falls back gracefully)."""
    if buffers is None or not _HAS_BUFFERED:
        return pl.BlockSpec(shape, index_map)
    return pl.BlockSpec(shape, index_map, pipeline_mode=pl.Buffered(buffers))


# --------------------------------------------------------------------------- #
# Kernel
# --------------------------------------------------------------------------- #
def _hyperbolic_linear_kernel(x_ref, wt_ref, b_ref, o_ref, acc_ref, ssq_ref, *,
                              c, eps, matmul_dtype):
    k = pl.program_id(1)
    nk = pl.num_programs(1)

    @pl.when(k == 0)
    def _init():
        acc_ref[...] = jnp.zeros_like(acc_ref)
        ssq_ref[...] = jnp.zeros_like(ssq_ref)

    # Per-K-tile contributions: f32 sum-of-squares for the row norm, and the
    # MXU partial matmul of the RAW tile (the per-row project/log-map scale is
    # a scalar per row, so it is factored out and applied after the matmul).
    xr = x_ref[...]
    xf = xr.astype(jnp.float32)
    ssq_ref[...] += jnp.sum(xf * xf, axis=-1, keepdims=True)
    acc_ref[...] += jnp.dot(xr.astype(matmul_dtype), wt_ref[...],
                            preferred_element_type=jnp.float32)

    @pl.when(k == nk - 1)
    def _finalize():
        sqrt_c = jnp.float32(math.sqrt(c))
        one_m_eps = jnp.float32(1.0 - eps)
        eps_f = jnp.float32(eps)
        v_max = jnp.float32(1.0 / (math.sqrt(c) * 1.1))

        # ---- project_to_ball: per-row scale (exact divides; (tm,1) so the
        # cost is nil — approximate reciprocals here are catastrophic because
        # arctanh is ill-conditioned near 1 - eps). -------------------------
        norm = jnp.sqrt(ssq_ref[...])                                  # (tm, 1)
        proj_scale = jnp.where(norm > one_m_eps,
                               one_m_eps / jnp.maximum(norm, eps_f),
                               jnp.ones_like(norm))

        # ---- log_map_zero: per-row scale -----------------------------------
        y_norm = jnp.maximum(norm * proj_scale, eps_f)
        y_norm_clipped = jnp.minimum(y_norm, one_m_eps)
        z = jnp.minimum(sqrt_c * y_norm_clipped, one_m_eps)
        # arctanh(z) = 0.5*log((1+z)/(1-z)); z <= 1-eps so 1-z >= eps > 0.
        artanh = 0.5 * jnp.log((1.0 + z) / (1.0 - z))
        log_scale = artanh / (sqrt_c * y_norm_clipped)
        # NOTE: the reference's where(y_norm < eps, y, ...) is unreachable
        # because y_norm is clamped to >= eps above -> omitted.
        row_scale = proj_scale * log_scale                             # (tm, 1)

        # ---- F.linear epilogue ----------------------------------------------
        t = row_scale * acc_ref[...] + b_ref[...].astype(jnp.float32)

        # ---- exp_map_zero -----------------------------------------------------
        v_norm = jnp.maximum(jnp.sqrt(jnp.sum(t * t, axis=-1, keepdims=True)),
                             eps_f)
        v_norm_clipped = jnp.minimum(v_norm, v_max)
        scv = sqrt_c * v_norm_clipped
        out = (jnp.tanh(scv) / scv) * t
        # (where(v_norm < eps, t, out) likewise unreachable -> omitted.)
        o_ref[...] = out.astype(o_ref.dtype)


# --------------------------------------------------------------------------- #
# Wrapper
# --------------------------------------------------------------------------- #
def make_hyperbolic_linear(weight, bias=None, *, c=1.0, eps=1e-5,
                           matmul_dtype=jnp.bfloat16, out_dtype=None,
                           tm=None, tk=None, interpret=False):
    """Prepare (transpose/cast/pad) the parameters ONCE and return x -> out.

    weight: (out_features, in_features); bias: (out_features,) or None.
    matmul_dtype: dtype fed to the MXU (bf16 halves weight VMEM/DMA; f32 acc).
                  Pass None / jnp.float32 for an exact-precision matmul.
    """
    out_features, in_features = weight.shape
    if matmul_dtype is None:
        matmul_dtype = jnp.float32
    w_itemsize = jnp.dtype(matmul_dtype).itemsize

    out_p = _round_up(out_features, 128)

    try:
        vmem_cap = int(pltpu.get_tpu_info().vmem_capacity_bytes)
    except Exception:
        vmem_cap = 64 * 1024 * 1024           # conservative (v7x per-core VMEM)
    budget = (vmem_cap * 3) // 4

    in_aligned = _round_up(in_features, 128)
    if tk is not None and (tk % 128 != 0 or in_aligned % tk != 0):
        tk = None                              # invalid override -> auto

    resident_bytes = in_aligned * out_p * w_itemsize
    if tk is None and resident_bytes <= budget // 2:
        # Whole transposed weight stays resident in VMEM, single-buffered.
        k_dim, k_tile, grid_k = in_features, in_features, 1
        w_buffers = 1 if _HAS_BUFFERED else 2
    else:
        # Tile the contraction (K) axis: bounds weight VMEM to 2*tk*out_p bytes.
        k_dim = in_aligned
        if tk is None:
            k_tile = k_dim
            while k_tile > 128 and 2 * k_tile * out_p * w_itemsize > (2 * budget) // 5:
                half = k_tile // 2
                if half % 128 == 0 and k_dim % half == 0:
                    k_tile = half
                else:
                    k_tile = 128
            if k_dim % k_tile != 0:
                k_tile = 128
        else:
            k_tile = tk
        grid_k = k_dim // k_tile
        w_buffers = 1 if (grid_k == 1 and _HAS_BUFFERED) else 2
        # TODO(synk): very large out_features with tiny VMEM would additionally
        # need an N (out_features) grid axis; not implemented.

    # One-time parameter transform (cache the returned closure across calls).
    w_t = weight.T.astype(matmul_dtype)
    if k_dim != in_features or out_p != out_features:
        w_t = jnp.pad(w_t, ((0, k_dim - in_features), (0, out_p - out_features)))
    if bias is None:
        b_row = jnp.zeros((1, out_p), jnp.float32)
    else:
        b_row = bias.astype(jnp.float32).reshape(1, out_features)
        if out_p != out_features:
            b_row = jnp.pad(b_row, ((0, 0), (0, out_p - out_features)))

    kernel = functools.partial(_hyperbolic_linear_kernel, c=float(c),
                               eps=float(eps), matmul_dtype=matmul_dtype)

    def forward(x):
        if x.shape[-1] != in_features:
            raise ValueError(f"expected last dim {in_features}, got {x.shape}")
        orig_shape = x.shape
        x2d = x.reshape(-1, in_features)
        M = x2d.shape[0]
        if k_dim != in_features:            # only when K-tiling a non-128 K
            x2d = jnp.pad(x2d, ((0, 0), (0, k_dim - in_features)))

        x_itemsize = jnp.dtype(x2d.dtype).itemsize
        odtype = jnp.dtype(out_dtype) if out_dtype is not None else x.dtype
        o_itemsize = jnp.dtype(odtype).itemsize

        # ---- row-tile selection under a realistic VMEM model -------------
        def vmem_usage(rows):
            w = w_buffers * k_tile * out_p * w_itemsize
            bias_b = 2 * out_p * 4
            x_io = 2 * rows * k_tile * x_itemsize         # double-buffered x DMA
            x_tmp = rows * k_tile * (4 + w_itemsize)      # f32 copy + MXU cast
            out_io = 2 * rows * out_p * o_itemsize        # double-buffered out DMA
            acc = rows * out_p * 4                        # accumulator scratch
            ssq = rows * 128 * 4                          # (tm,1) scratch (padded)
            epi = 2 * rows * out_p * 4                    # t / out f32 temporaries
            return w + bias_b + x_io + x_tmp + out_io + acc + ssq + epi

        rows = tm if tm is not None else 512
        rows = max(8, _round_up(min(rows, max(M, 1)), 8))
        while rows > 8 and vmem_usage(rows) > budget:
            rows = max(8, _round_up(rows // 2, 8))
        if tm is None and M > 8 and pl.cdiv(M, rows) < 2:
            # >=2 row tiles so the "parallel" axis can shard across the two
            # v7x TensorCores (costs one extra ~0.35us grid step elsewhere).
            rows = max(8, _round_up(pl.cdiv(M, 2), 8))
        grid_m = pl.cdiv(M, rows)

        vmem_limit = int(min(vmem_cap, max(vmem_usage(rows) + (16 << 20), 32 << 20)))

        cost = pl.CostEstimate(
            flops=2 * M * k_dim * out_p,
            transcendentals=4 * M,
            bytes_accessed=(M * k_dim * x_itemsize
                            + (grid_m if grid_k > 1 else 1) * k_dim * out_p * w_itemsize
                            + M * out_p * o_itemsize),
        )

        x_map = lambda i, k: (i, k)
        w_map = lambda i, k: (k, 0)
        b_map = lambda i, k: (0, 0)
        o_map = lambda i, k: (i, 0)

        def run(use_buffered):
            in_specs = [
                pl.BlockSpec((rows, k_tile), x_map),
                _spec((k_tile, out_p), w_map,
                      1 if (use_buffered and grid_k == 1) else None),
                _spec((1, out_p), b_map, 1 if use_buffered else None),
            ]
            return pl.pallas_call(
                kernel,
                out_shape=jax.ShapeDtypeStruct((M, out_p), odtype),
                grid_spec=pltpu.PrefetchScalarGridSpec(
                    num_scalar_prefetch=0,
                    grid=(grid_m, grid_k),
                    in_specs=in_specs,
                    out_specs=pl.BlockSpec((rows, out_p), o_map),
                    scratch_shapes=[pltpu.VMEM((rows, out_p), jnp.float32),
                                    pltpu.VMEM((rows, 1), jnp.float32)],
                ),
                compiler_params=pltpu.CompilerParams(
                    dimension_semantics=("parallel", "arbitrary"),
                    vmem_limit_bytes=vmem_limit,
                ),
                cost_estimate=cost,
                interpret=interpret,
            )(x2d, w_t, b_row)

        if _HAS_BUFFERED:
            try:
                out2d = run(True)
            except Exception:       # this jax build rejects Buffered(1) specs
                out2d = run(False)
        else:
            out2d = run(False)

        if out_p != out_features:
            out2d = out2d[:, :out_features]
        return out2d.reshape(*orig_shape[:-1], out_features)

    return forward


def hyperbolic_linear(x, weight, bias=None, **kwargs):
    """One-shot convenience wrapper.  For repeated calls with the same
    parameters, use make_hyperbolic_linear once (caches the weight transform)."""
    return make_hyperbolic_linear(weight, bias, **kwargs)(x)


# ---------------- pure-JAX reference (mirrors the PyTorch module) ----------------
def hyperbolic_linear_reference(x, weight, bias, c=1.0, eps=1e-5):
    orig_shape = x.shape
    x2d = x.reshape(-1, orig_shape[-1]).astype(jnp.float32)
    sqrt_c = jnp.sqrt(jnp.float32(c))

    norm = jnp.sqrt(jnp.sum(x2d * x2d, axis=-1, keepdims=True))
    scale = jnp.where(norm > 1.0 - eps, (1.0 - eps) / norm, jnp.ones_like(norm))
    xp = x2d * scale

    y_norm = jnp.maximum(jnp.sqrt(jnp.sum(xp * xp, axis=-1, keepdims=True)), eps)
    y_norm_clipped = jnp.minimum(y_norm, 1.0 - eps)
    sc = jnp.minimum(sqrt_c * y_norm_clipped, 1.0 - eps)
    log_x = jnp.arctanh(sc) / (sqrt_c * y_norm_clipped) * xp
    log_x = jnp.where(y_norm < eps, xp, log_x)

    b = jnp.zeros((weight.shape[0],), jnp.float32) if bias is None else bias.astype(jnp.float32)
    t = log_x @ weight.astype(jnp.float32).T + b

    v_norm = jnp.maximum(jnp.sqrt(jnp.sum(t * t, axis=-1, keepdims=True)), eps)
    v_norm_clipped = jnp.minimum(v_norm, 1.0 / (sqrt_c * 1.1))
    tanh_term = jnp.tanh(sqrt_c * v_norm_clipped)
    out = tanh_term / (sqrt_c * v_norm_clipped) * t
    out = jnp.where(v_norm < eps, t, out)
    return out.reshape(*orig_shape[:-1], weight.shape[0])


def init_params(key, in_features, out_features):
    """Deterministic parameter init mirroring HyperbolicLinear.reset_parameters."""
    kw, kb = jax.random.split(key)
    std = math.sqrt(2.0 / (in_features + out_features)) * 0.5
    weight = jax.random.uniform(kw, (out_features, in_features),
                                minval=-std, maxval=std, dtype=jnp.float32)
    bound = (1.0 / math.sqrt(in_features)) * 0.1
    bias = jax.random.uniform(kb, (out_features,),
                              minval=-bound, maxval=bound, dtype=jnp.float32)
    return weight, bias


if __name__ == "__main__":
    key = jax.random.PRNGKey(0)
    kx, kp, kx2, kp2 = jax.random.split(key, 4)

    # ---- Test 1: batch=2, seq=8, 32 -> 32; inputs outside the unit ball so the
    # projection/clipping branch is exercised. -----------------------------------
    in_features, out_features = 32, 32
    x = 0.5 * jax.random.normal(kx, (2, 8, in_features), dtype=jnp.float32)
    weight, bias = init_params(kp, in_features, out_features)

    fwd_bf16 = make_hyperbolic_linear(weight, bias, c=1.0)            # bf16 MXU
    out = jax.block_until_ready(fwd_bf16(x))
    ref = hyperbolic_linear_reference(x, weight, bias, c=1.0)

    assert out.shape == (2, 8, out_features)
    assert bool(jnp.all(jnp.isfinite(out)))
    err_bf16 = float(jnp.max(jnp.abs(out.astype(jnp.float32) - ref)))
    # Clipped rows sit on the ball boundary where arctanh(1 - eps) amplifies fp
    # rounding by ~5e4, so any two faithful f32 implementations differ at the
    # ~1% level in the log-map scale; hence the loose absolute tolerance.
    assert err_bf16 < 3e-2, f"bf16 max abs err {err_bf16} vs reference"

    fwd_f32 = make_hyperbolic_linear(weight, bias, c=1.0, matmul_dtype=jnp.float32)
    out32 = jax.block_until_ready(fwd_f32(x))
    err_f32 = float(jnp.max(jnp.abs(out32.astype(jnp.float32) - ref)))
    assert err_f32 < 2e-2, f"f32 max abs err {err_f32} vs reference"

    # ---- Test 2: exercises the K-tiled accumulator path (grid_k > 1). ----------
    in2, out2 = 256, 64
    x2 = 0.05 * jax.random.normal(kx2, (16, in2), dtype=jnp.float32)  # inside ball
    w2, b2 = init_params(kp2, in2, out2)
    fwd_k = make_hyperbolic_linear(w2, b2, c=1.0, tk=128)
    outk = jax.block_until_ready(fwd_k(x2))
    refk = hyperbolic_linear_reference(x2, w2, b2, c=1.0)
    assert outk.shape == (16, out2)
    errk = float(jnp.max(jnp.abs(outk.astype(jnp.float32) - refk)))
    assert errk < 5e-3, f"K-tiled max abs err {errk} vs reference"

    print("KERNEL_OK")
</pallas_src>

<mosaic_0001>
module attributes {stable_mosaic.version = 11 : i64} {
  func.func @_hyperbolic_linear_kernel(%arg0: i32, %arg1: i32, %arg2: memref<8x32xf32, #tpu.memory_space<vmem>>, %arg3: memref<32x128xbf16, #tpu.memory_space<vmem>>, %arg4: memref<1x128xf32, #tpu.memory_space<vmem>>, %arg5: memref<8x128xf32, #tpu.memory_space<vmem>>, %arg6: memref<8x128xf32, #tpu.memory_space<vmem>>, %arg7: memref<8x1xf32, #tpu.memory_space<vmem>>) attributes {dimension_semantics = [#tpu.dimension_semantics<parallel>, #tpu.dimension_semantics<arbitrary>], iteration_bounds = array<i64: 2, 1>, scalar_prefetch = 0 : i64, scratch_operands = 2 : i64, tpu.core_type = #tpu.core_type<tc>, window_params = [{transform_indices = @transform_0, window_bounds = array<i64: 8, 32>}, {pipeline_mode = #tpu.pipeline_mode<synchronous>, transform_indices = @transform_1, window_bounds = array<i64: 32, 128>}, {pipeline_mode = #tpu.pipeline_mode<synchronous>, transform_indices = @transform_2, window_bounds = array<i64: 1, 128>}, {transform_indices = @transform_3, window_bounds = array<i64: 8, 128>}]} {
    %c0_i32 = arith.constant 0 : i32
    %0 = arith.cmpi eq, %arg1, %c0_i32 : i32
    %1 = arith.extui %0 : i1 to i32
    %c0_i32_0 = arith.constant 0 : i32
    %2 = arith.cmpi ne, %1, %c0_i32_0 : i32
    scf.if %2 {
      %cst_15 = arith.constant 0.000000e+00 : f32
      %19 = vector.broadcast %cst_15 : f32 to vector<8x128xf32>
      %c0_16 = arith.constant 0 : index
      %c0_17 = arith.constant 0 : index
      %20 = vector.load %arg6[%c0_16, %c0_17] : memref<8x128xf32, #tpu.memory_space<vmem>>, vector<8x128xf32>
      tpu.vector_store %arg6[%c0_16, %c0_17], %19 {strides = array<i32>} : memref<8x128xf32, #tpu.memory_space<vmem>>, vector<8x128xf32>,
      %cst_18 = arith.constant 0.000000e+00 : f32
      %21 = vector.broadcast %cst_18 : f32 to vector<8x1xf32>
      %c0_19 = arith.constant 0 : index
      %c0_20 = arith.constant 0 : index
      %22 = vector.load %arg7[%c0_19, %c0_20] : memref<8x1xf32, #tpu.memory_space<vmem>>, vector<8x1xf32>
      tpu.vector_store %arg7[%c0_19, %c0_20], %21 {strides = array<i32>} : memref<8x1xf32, #tpu.memory_space<vmem>>, vector<8x1xf32>,
    } else {
    }
    %c0 = arith.constant 0 : index
    %c0_1 = arith.constant 0 : index
    %3 = vector.load %arg2[%c0, %c0_1] : memref<8x32xf32, #tpu.memory_space<vmem>>, vector<8x32xf32>
    %c0_2 = arith.constant 0 : index
    %c0_3 = arith.constant 0 : index
    %4 = vector.load %arg7[%c0_2, %c0_3] : memref<8x1xf32, #tpu.memory_space<vmem>>, vector<8x1xf32>
    %5 = arith.mulf %3, %3 : vector<8x32xf32>
    %cst = arith.constant dense<0.000000e+00> : vector<8xf32>
    %6 = vector.multi_reduction <add>, %5, %cst [1] : vector<8x32xf32> to vector<8xf32>
    %7 = vector.shape_cast %6 : vector<8xf32> to vector<8x1xf32>
    %8 = arith.addf %4, %7 : vector<8x1xf32>
    %c0_4 = arith.constant 0 : index
    %c0_5 = arith.constant 0 : index
    %9 = vector.load %arg7[%c0_4, %c0_5] : memref<8x1xf32, #tpu.memory_space<vmem>>, vector<8x1xf32>
    tpu.vector_store %arg7[%c0_4, %c0_5], %8 {strides = array<i32>} : memref<8x1xf32, #tpu.memory_space<vmem>>, vector<8x1xf32>,
    %c0_6 = arith.constant 0 : index
    %c0_7 = arith.constant 0 : index
    %10 = vector.load %arg6[%c0_6, %c0_7] : memref<8x128xf32, #tpu.memory_space<vmem>>, vector<8x128xf32>
    %11 = arith.truncf %3 : vector<8x32xf32> to vector<8x32xbf16>
    %c0_8 = arith.constant 0 : index
    %c0_9 = arith.constant 0 : index
    %12 = vector.load %arg3[%c0_8, %c0_9] : memref<32x128xbf16, #tpu.memory_space<vmem>>, vector<32x128xbf16>
    %cst_10 = arith.constant dense<0.000000e+00> : vector<8x128xf32>
    %13 = tpu.matmul %11, %12, %cst_10 {dimension_numbers = #tpu.dot_dimension_numbers<[1], [0], [0], [1], [0, 0, 1, 1], [], []>} : vector<8x32xbf16>, vector<32x128xbf16>, vector<8x128xf32> -> vector<8x128xf32>
    %14 = arith.addf %10, %13 : vector<8x128xf32>
    %c0_11 = arith.constant 0 : index
    %c0_12 = arith.constant 0 : index
    %15 = vector.load %arg6[%c0_11, %c0_12] : memref<8x128xf32, #tpu.memory_space<vmem>>, vector<8x128xf32>
    tpu.vector_store %arg6[%c0_11, %c0_12], %14 {strides = array<i32>} : memref<8x128xf32, #tpu.memory_space<vmem>>, vector<8x128xf32>,
    %c0_i32_13 = arith.constant 0 : i32
    %16 = arith.cmpi eq, %arg1, %c0_i32_13 : i32
    %17 = arith.extui %16 : i1 to i32
    %c0_i32_14 = arith.constant 0 : i32
    %18 = arith.cmpi ne, %17, %c0_i32_14 : i32
    scf.if %18 {
      %c0_15 = arith.constant 0 : index
      %c0_16 = arith.constant 0 : index
      %19 = vector.load %arg7[%c0_15, %c0_16] : memref<8x1xf32, #tpu.memory_space<vmem>>, vector<8x1xf32>
      %20 = math.sqrt %19 : vector<8x1xf32>
      %cst_17 = arith.constant 0.999989986 : f32
      %21 = vector.broadcast %cst_17 : f32 to vector<8x1xf32>
      %22 = arith.cmpf ogt, %20, %21 : vector<8x1xf32>
      %cst_18 = arith.constant 9.99999974E-6 : f32
      %23 = vector.broadcast %cst_18 : f32 to vector<8x1xf32>
      %24 = arith.maximumf %20, %23 : vector<8x1xf32>
      %cst_19 = arith.constant 0.999989986 : f32
      %25 = vector.broadcast %cst_19 : f32 to vector<8x1xf32>
      %26 = arith.divf %25, %24 : vector<8x1xf32>
      %cst_20 = arith.constant 1.000000e+00 : f32
      %27 = vector.broadcast %cst_20 : f32 to vector<8x1xf32>
      %28 = arith.select %22, %26, %27 : vector<8x1xi1>, vector<8x1xf32>
      %29 = arith.mulf %20, %28 : vector<8x1xf32>
      %cst_21 = arith.constant 9.99999974E-6 : f32
      %30 = vector.broadcast %cst_21 : f32 to vector<8x1xf32>
      %31 = arith.maximumf %29, %30 : vector<8x1xf32>
      %cst_22 = arith.constant 0.999989986 : f32
      %32 = vector.broadcast %cst_22 : f32 to vector<8x1xf32>
      %33 = arith.minimumf %31, %32 : vector<8x1xf32>
      %cst_23 = arith.constant 1.000000e+00 : f32
      %34 = vector.broadcast %cst_23 : f32 to vector<8x1xf32>
      %35 = arith.mulf %34, %33 : vector<8x1xf32>
      %cst_24 = arith.constant 0.999989986 : f32
      %36 = vector.broadcast %cst_24 : f32 to vector<8x1xf32>
      %37 = arith.minimumf %35, %36 : vector<8x1xf32>
      %cst_25 = arith.constant 1.000000e+00 : f32
      %38 = vector.broadcast %cst_25 : f32 to vector<8x1xf32>
      %39 = arith.addf %38, %37 : vector<8x1xf32>
      %cst_26 = arith.constant 1.000000e+00 : f32
      %40 = vector.broadcast %cst_26 : f32 to vector<8x1xf32>
      %41 = arith.subf %40, %37 : vector<8x1xf32>
      %42 = arith.divf %39, %41 : vector<8x1xf32>
      %43 = math.log %42 : vector<8x1xf32>
      %cst_27 = arith.constant 5.000000e-01 : f32
      %44 = vector.broadcast %cst_27 : f32 to vector<8x1xf32>
      %45 = arith.mulf %44, %43 : vector<8x1xf32>
      %cst_28 = arith.constant 1.000000e+00 : f32
      %46 = vector.broadcast %cst_28 : f32 to vector<8x1xf32>
      %47 = arith.mulf %46, %33 : vector<8x1xf32>
      %48 = arith.divf %45, %47 : vector<8x1xf32>
      %49 = arith.mulf %28, %48 : vector<8x1xf32>
      %c0_29 = arith.constant 0 : index
      %c0_30 = arith.constant 0 : index
      %50 = vector.load %arg6[%c0_29, %c0_30] : memref<8x128xf32, #tpu.memory_space<vmem>>, vector<8x128xf32>
      %51 = vector.broadcast %49 : vector<8x1xf32> to vector<8x128xf32>
      %52 = arith.mulf %51, %50 : vector<8x128xf32>
      %c0_31 = arith.constant 0 : index
      %c0_32 = arith.constant 0 : index
      %53 = vector.load %arg4[%c0_31, %c0_32] : memref<1x128xf32, #tpu.memory_space<vmem>>, vector<1x128xf32>
      %54 = vector.broadcast %53 : vector<1x128xf32> to vector<8x128xf32>
      %55 = arith.addf %52, %54 : vector<8x128xf32>
      %56 = arith.mulf %55, %55 : vector<8x128xf32>
      %cst_33 = arith.constant dense<0.000000e+00> : vector<8xf32>
      %57 = vector.multi_reduction <add>, %56, %cst_33 [1] : vector<8x128xf32> to vector<8xf32>
      %58 = vector.shape_cast %57 : vector<8xf32> to vector<8x1xf32>
      %59 = math.sqrt %58 : vector<8x1xf32>
      %cst_34 = arith.constant 9.99999974E-6 : f32
      %60 = vector.broadcast %cst_34 : f32 to vector<8x1xf32>
      %61 = arith.maximumf %59, %60 : vector<8x1xf32>
      %cst_35 = arith.constant 0.909090936 : f32
      %62 = vector.broadcast %cst_35 : f32 to vector<8x1xf32>
      %63 = arith.minimumf %61, %62 : vector<8x1xf32>
      %cst_36 = arith.constant 1.000000e+00 : f32
      %64 = vector.broadcast %cst_36 : f32 to vector<8x1xf32>
      %65 = arith.mulf %64, %63 : vector<8x1xf32>
      %66 = math.tanh %65 : vector<8x1xf32>
      %67 = arith.divf %66, %65 : vector<8x1xf32>
      %68 = vector.broadcast %67 : vector<8x1xf32> to vector<8x128xf32>
      %69 = arith.mulf %68, %55 : vector<8x128xf32>
      %c0_37 = arith.constant 0 : index
      %c0_38 = arith.constant 0 : index
      %70 = vector.load %arg5[%c0_37, %c0_38] : memref<8x128xf32, #tpu.memory_space<vmem>>, vector<8x128xf32>
      tpu.vector_store %arg5[%c0_37, %c0_38], %69 {strides = array<i32>} : memref<8x128xf32, #tpu.memory_space<vmem>>, vector<8x128xf32>,
    } else {
    }
    return
  }
  func.func @transform_0(%arg0: i32, %arg1: i32) -> (i32, i32) {
    %c0_i32 = arith.constant 0 : i32
    return %arg0, %arg1 : i32, i32
  }
  func.func @transform_1(%arg0: i32, %arg1: i32) -> (i32, i32) {
    %c0_i32 = arith.constant 0 : i32
    %c0_i32_0 = arith.constant 0 : i32
    return %arg1, %c0_i32 : i32, i32
  }
  func.func @transform_2(%arg0: i32, %arg1: i32) -> (i32, i32) {
    %c0_i32 = arith.constant 0 : i32
    %c0_i32_0 = arith.constant 0 : i32
    %c0_i32_1 = arith.constant 0 : i32
    return %c0_i32, %c0_i32_0 : i32, i32
  }
  func.func @transform_3(%arg0: i32, %arg1: i32) -> (i32, i32) {
    %c0_i32 = arith.constant 0 : i32
    %c0_i32_0 = arith.constant 0 : i32
    return %arg0, %c0_i32 : i32, i32
  }
}

module attributes {stable_mosaic.version = 11 : i64} {
  func.func @_hyperbolic_linear_kernel(%arg0: i32, %arg1: i32, %arg2: memref<8x32xf32, #tpu.memory_space<vmem>>, %arg3: memref<32x128xbf16, #tpu.memory_space<vmem>>, %arg4: memref<1x128xf32, #tpu.memory_space<vmem>>, %arg5: memref<8x128xf32, #tpu.memory_space<vmem>>, %arg6: memref<8x128xf32, #tpu.memory_space<vmem>>, %arg7: memref<8x1xf32, #tpu.memory_space<vmem>>) attributes {dimension_semantics = [#tpu.dimension_semantics<parallel>, #tpu.dimension_semantics<arbitrary>], iteration_bounds = array<i64: 2, 1>, scalar_prefetch = 0 : i64, scratch_operands = 2 : i64, tpu.core_type = #tpu.core_type<tc>, window_params = [{transform_indices = @transform_0, window_bounds = array<i64: 8, 32>}, {transform_indices = @transform_1, window_bounds = array<i64: 32, 128>}, {pipeline_mode = #tpu.pipeline_mode<synchronous>, transform_indices = @transform_2, window_bounds = array<i64: 1, 128>}, {transform_indices = @transform_3, window_bounds = array<i64: 8, 128>}]} {
    %c0_i32 = arith.constant 0 : i32
    %0 = arith.cmpi eq, %arg1, %c0_i32 : i32
    %1 = arith.extui %0 : i1 to i32
    %c0_i32_0 = arith.constant 0 : i32
    %2 = arith.cmpi ne, %1, %c0_i32_0 : i32
    scf.if %2 {
      %cst_15 = arith.constant 0.000000e+00 : f32
      %19 = vector.broadcast %cst_15 : f32 to vector<8x128xf32>
      %c0_16 = arith.constant 0 : index
      %c0_17 = arith.constant 0 : index
      %20 = vector.load %arg6[%c0_16, %c0_17] : memref<8x128xf32, #tpu.memory_space<vmem>>, vector<8x128xf32>
      tpu.vector_store %arg6[%c0_16, %c0_17], %19 {strides = array<i32>} : memref<8x128xf32, #tpu.memory_space<vmem>>, vector<8x128xf32>,
      %cst_18 = arith.constant 0.000000e+00 : f32
      %21 = vector.broadcast %cst_18 : f32 to vector<8x1xf32>
      %c0_19 = arith.constant 0 : index
      %c0_20 = arith.constant 0 : index
      %22 = vector.load %arg7[%c0_19, %c0_20] : memref<8x1xf32, #tpu.memory_space<vmem>>, vector<8x1xf32>
      tpu.vector_store %arg7[%c0_19, %c0_20], %21 {strides = array<i32>} : memref<8x1xf32, #tpu.memory_space<vmem>>, vector<8x1xf32>,
    } else {
    }
    %c0 = arith.constant 0 : index
    %c0_1 = arith.constant 0 : index
    %3 = vector.load %arg2[%c0, %c0_1] : memref<8x32xf32, #tpu.memory_space<vmem>>, vector<8x32xf32>
    %c0_2 = arith.constant 0 : index
    %c0_3 = arith.constant 0 : index
    %4 = vector.load %arg7[%c0_2, %c0_3] : memref<8x1xf32, #tpu.memory_space<vmem>>, vector<8x1xf32>
    %5 = arith.mulf %3, %3 : vector<8x32xf32>
    %cst = arith.constant dense<0.000000e+00> : vector<8xf32>
    %6 = vector.multi_reduction <add>, %5, %cst [1] : vector<8x32xf32> to vector<8xf32>
    %7 = vector.shape_cast %6 : vector<8xf32> to vector<8x1xf32>
    %8 = arith.addf %4, %7 : vector<8x1xf32>
    %c0_4 = arith.constant 0 : index
    %c0_5 = arith.constant 0 : index
    %9 = vector.load %arg7[%c0_4, %c0_5] : memref<8x1xf32, #tpu.memory_space<vmem>>, vector<8x1xf32>
    tpu.vector_store %arg7[%c0_4, %c0_5], %8 {strides = array<i32>} : memref<8x1xf32, #tpu.memory_space<vmem>>, vector<8x1xf32>,
    %c0_6 = arith.constant 0 : index
    %c0_7 = arith.constant 0 : index
    %10 = vector.load %arg6[%c0_6, %c0_7] : memref<8x128xf32, #tpu.memory_space<vmem>>, vector<8x128xf32>
    %11 = arith.truncf %3 : vector<8x32xf32> to vector<8x32xbf16>
    %c0_8 = arith.constant 0 : index
    %c0_9 = arith.constant 0 : index
    %12 = vector.load %arg3[%c0_8, %c0_9] : memref<32x128xbf16, #tpu.memory_space<vmem>>, vector<32x128xbf16>
    %cst_10 = arith.constant dense<0.000000e+00> : vector<8x128xf32>
    %13 = tpu.matmul %11, %12, %cst_10 {dimension_numbers = #tpu.dot_dimension_numbers<[1], [0], [0], [1], [0, 0, 1, 1], [], []>} : vector<8x32xbf16>, vector<32x128xbf16>, vector<8x128xf32> -> vector<8x128xf32>
    %14 = arith.addf %10, %13 : vector<8x128xf32>
    %c0_11 = arith.constant 0 : index
    %c0_12 = arith.constant 0 : index
    %15 = vector.load %arg6[%c0_11, %c0_12] : memref<8x128xf32, #tpu.memory_space<vmem>>, vector<8x128xf32>
    tpu.vector_store %arg6[%c0_11, %c0_12], %14 {strides = array<i32>} : memref<8x128xf32, #tpu.memory_space<vmem>>, vector<8x128xf32>,
    %c0_i32_13 = arith.constant 0 : i32
    %16 = arith.cmpi eq, %arg1, %c0_i32_13 : i32
    %17 = arith.extui %16 : i1 to i32
    %c0_i32_14 = arith.constant 0 : i32
    %18 = arith.cmpi ne, %17, %c0_i32_14 : i32
    scf.if %18 {
      %c0_15 = arith.constant 0 : index
      %c0_16 = arith.constant 0 : index
      %19 = vector.load %arg7[%c0_15, %c0_16] : memref<8x1xf32, #tpu.memory_space<vmem>>, vector<8x1xf32>
      %20 = math.sqrt %19 : vector<8x1xf32>
      %cst_17 = arith.constant 0.999989986 : f32
      %21 = vector.broadcast %cst_17 : f32 to vector<8x1xf32>
      %22 = arith.cmpf ogt, %20, %21 : vector<8x1xf32>
      %cst_18 = arith.constant 9.99999974E-6 : f32
      %23 = vector.broadcast %cst_18 : f32 to vector<8x1xf32>
      %24 = arith.maximumf %20, %23 : vector<8x1xf32>
      %cst_19 = arith.constant 0.999989986 : f32
      %25 = vector.broadcast %cst_19 : f32 to vector<8x1xf32>
      %26 = arith.divf %25, %24 : vector<8x1xf32>
      %cst_20 = arith.constant 1.000000e+00 : f32
      %27 = vector.broadcast %cst_20 : f32 to vector<8x1xf32>
      %28 = arith.select %22, %26, %27 : vector<8x1xi1>, vector<8x1xf32>
      %29 = arith.mulf %20, %28 : vector<8x1xf32>
      %cst_21 = arith.constant 9.99999974E-6 : f32
      %30 = vector.broadcast %cst_21 : f32 to vector<8x1xf32>
      %31 = arith.maximumf %29, %30 : vector<8x1xf32>
      %cst_22 = arith.constant 0.999989986 : f32
      %32 = vector.broadcast %cst_22 : f32 to vector<8x1xf32>
      %33 = arith.minimumf %31, %32 : vector<8x1xf32>
      %cst_23 = arith.constant 1.000000e+00 : f32
      %34 = vector.broadcast %cst_23 : f32 to vector<8x1xf32>
      %35 = arith.mulf %34, %33 : vector<8x1xf32>
      %cst_24 = arith.constant 0.999989986 : f32
      %36 = vector.broadcast %cst_24 : f32 to vector<8x1xf32>
      %37 = arith.minimumf %35, %36 : vector<8x1xf32>
      %cst_25 = arith.constant 1.000000e+00 : f32
      %38 = vector.broadcast %cst_25 : f32 to vector<8x1xf32>
      %39 = arith.addf %38, %37 : vector<8x1xf32>
      %cst_26 = arith.constant 1.000000e+00 : f32
      %40 = vector.broadcast %cst_26 : f32 to vector<8x1xf32>
      %41 = arith.subf %40, %37 : vector<8x1xf32>
      %42 = arith.divf %39, %41 : vector<8x1xf32>
      %43 = math.log %42 : vector<8x1xf32>
      %cst_27 = arith.constant 5.000000e-01 : f32
      %44 = vector.broadcast %cst_27 : f32 to vector<8x1xf32>
      %45 = arith.mulf %44, %43 : vector<8x1xf32>
      %cst_28 = arith.constant 1.000000e+00 : f32
      %46 = vector.broadcast %cst_28 : f32 to vector<8x1xf32>
      %47 = arith.mulf %46, %33 : vector<8x1xf32>
      %48 = arith.divf %45, %47 : vector<8x1xf32>
      %49 = arith.mulf %28, %48 : vector<8x1xf32>
      %c0_29 = arith.constant 0 : index
      %c0_30 = arith.constant 0 : index
      %50 = vector.load %arg6[%c0_29, %c0_30] : memref<8x128xf32, #tpu.memory_space<vmem>>, vector<8x128xf32>
      %51 = vector.broadcast %49 : vector<8x1xf32> to vector<8x128xf32>
      %52 = arith.mulf %51, %50 : vector<8x128xf32>
      %c0_31 = arith.constant 0 : index
      %c0_32 = arith.constant 0 : index
      %53 = vector.load %arg4[%c0_31, %c0_32] : memref<1x128xf32, #tpu.memory_space<vmem>>, vector<1x128xf32>
      %54 = vector.broadcast %53 : vector<1x128xf32> to vector<8x128xf32>
      %55 = arith.addf %52, %54 : vector<8x128xf32>
      %56 = arith.mulf %55, %55 : vector<8x128xf32>
      %cst_33 = arith.constant dense<0.000000e+00> : vector<8xf32>
      %57 = vector.multi_reduction <add>, %56, %cst_33 [1] : vector<8x128xf32> to vector<8xf32>
      %58 = vector.shape_cast %57 : vector<8xf32> to vector<8x1xf32>
      %59 = math.sqrt %58 : vector<8x1xf32>
      %cst_34 = arith.constant 9.99999974E-6 : f32
      %60 = vector.broadcast %cst_34 : f32 to vector<8x1xf32>
      %61 = arith.maximumf %59, %60 : vector<8x1xf32>
      %cst_35 = arith.constant 0.909090936 : f32
      %62 = vector.broadcast %cst_35 : f32 to vector<8x1xf32>
      %63 = arith.minimumf %61, %62 : vector<8x1xf32>
      %cst_36 = arith.constant 1.000000e+00 : f32
      %64 = vector.broadcast %cst_36 : f32 to vector<8x1xf32>
      %65 = arith.mulf %64, %63 : vector<8x1xf32>
      %66 = math.tanh %65 : vector<8x1xf32>
      %67 = arith.divf %66, %65 : vector<8x1xf32>
      %68 = vector.broadcast %67 : vector<8x1xf32> to vector<8x128xf32>
      %69 = arith.mulf %68, %55 : vector<8x128xf32>
      %c0_37 = arith.constant 0 : index
      %c0_38 = arith.constant 0 : index
      %70 = vector.load %arg5[%c0_37, %c0_38] : memref<8x128xf32, #tpu.memory_space<vmem>>, vector<8x128xf32>
      tpu.vector_store %arg5[%c0_37, %c0_38], %69 {strides = array<i32>} : memref<8x128xf32, #tpu.memory_space<vmem>>, vector<8x128xf32>,
    } else {
    }
    return
  }
  func.func @transform_0(%arg0: i32, %arg1: i32) -> (i32, i32) {
    %c0_i32 = arith.constant 0 : i32
    return %arg0, %arg1 : i32, i32
  }
  func.func @transform_1(%arg0: i32, %arg1: i32) -> (i32, i32) {
    %c0_i32 = arith.constant 0 : i32
    %c0_i32_0 = arith.constant 0 : i32
    return %arg1, %c0_i32 : i32, i32
  }
  func.func @transform_2(%arg0: i32, %arg1: i32) -> (i32, i32) {
    %c0_i32 = arith.constant 0 : i32
    %c0_i32_0 = arith.constant 0 : i32
    %c0_i32_1 = arith.constant 0 : i32
    return %c0_i32, %c0_i32_0 : i32, i32
  }
  func.func @transform_3(%arg0: i32, %arg1: i32) -> (i32, i32) {
    %c0_i32 = arith.constant 0 : i32
    %c0_i32_0 = arith.constant 0 : i32
    return %arg0, %c0_i32 : i32, i32
  }
}

</mosaic_0001>

<bundles_post_ra>
// kernel: tpu_custom_call.1
= control target key start
LH: loop header
LB: loop body
LE: loop exit
PB: predicated region body
PF: predicated region fallthrough
CT: control target
= control target key end

     0   :  { %8 = vsyncpa [#allocation5], 0  ;;  %s997_s0 = inlined_call_operand.hbm [shape: f32[16,32], index: 0, kind: input, shape index: {}]   ;;  %s998_s1 = inlined_call_operand.hbm [shape: bf16[32,128], index: 1, kind: input, shape index: {}]   ;;  %s999_s2 = inlined_call_operand.vmem [shape: f32[1,128], index: 2, kind: input, shape index: {}]   ;;  %s1000_s3 = inlined_call_operand.hbm [shape: f32[16,128], index: 3, kind: output, shape index: {}]  }
   0x1   :  { %10 = vsyncpa [#allocation5 + $0x1], 0 }
   0x2   :  { %11 = vsyncpa [#allocation8], 0 }
   0x3   :  { %12 = vsyncpa [#allocation6], 0 }
   0x4   :  { %14 = vsyncpa [#allocation6 + $0x1], 0  ;;  %s774_s12 = smov 0   ;;  %s776_s13 = smov 0  }
   0x5   :  { %s778_s14 = smov 0   ;;  %s780_s15 = smov 0  }
   0x6   :  { %s782_s16 = smov 0   ;;  %s784_s17 = smov 0  }
   0x7 LB: > { %s473_s18 = sadd.s32 4294967295, %s744_s17   ;;  %s474_s19 = sadd.s32 4294967294, %s744_s17   ;;  %s744_s17 = sphi %s784_s17, %s20_s17   ;;  %s740_s16 = sphi %s782_s16, %s1024_s16   ;;  %s736_s15 = sphi %s780_s15, %s1023_s15   ;;  %s732_s14 = sphi %s778_s14, %s1022_s14   ;;  %s728_s13 = sphi %s776_s13, %s1021_s13   ;;  %s724_s12 = sphi %s774_s12, %s1020_s12  }
   0x8   : > { %p54_p0 = scmp.ne.s32.totalorder %s728_s13, %s724_s12  ;;  %p808_p1 = scmp.eq.s32.totalorder %s473_s18, 0 }
   0x9   : > { %p812_p2 = scmp.eq.s32.totalorder %s473_s18, 1  ;;  %p131_p3 = scmp.eq.s32.totalorder %s474_s19, 1 }
   0xa   : > { %s1005_s20 = scalar_select %p808_p1, 1, 0 }
   0xb   : > { %s1006_s21 = scalar_select %p812_p2, 1, 0 }
   0xc   : > { %p818_p4 = por %p808_p1, %p54_p0  ;;  %p475_p5 = scmp.ge.s32.totalorder %s744_s17, 1 }
   0xd   : > { %p823_p6 = por %p131_p3, %p54_p0  ;;  %p138_p7 = scmp.lt.s32.totalorder %s744_s17, 3 }
   0xe   : > { %s1007_s22 = scalar_select %p818_p4, 1, 0 }
   0xf   : > { %s1008_s23 = scalar_select %p823_p6, 1, 0 }
  0x10   : > { %p828_p8 = pnand %p475_p5, %p138_p7  ;;  %s746_s25 = smov [#allocation7]  }
  0x11   : > { %s153_s26 = sshll.u32 %s746_s25, 4  ;;  %s32_s28 = sadd.s32 1, %s740_s16  ;;  %s154_s26 = int_to_ptr.vmem [resolvable:$true] %s153_s26 }
  0x12   : > { %s1009_s24 = scalar_select %p828_p8, 1, 0 }
  0x13   : > { %p511_p9 = pneg %p828_p8  ;;  %s600_s4 = scalar_lea.hbm %s998_s1, 256 }
  0x14   : > { %p601_p12 = scmp.ne.s32.totalorder %s998_s1, %s600_s4  ;;  %p607_p5 = scmp.lt.u32.totalorder %s600_s4, %s998_s1 }
  0x15   : > { %p837_p11 = pnand %p511_p9, %p808_p1 }
  0x17   : > { %p602_p13 = pneg %p837_p11 }
  0x19   : > { %p603_p0 = pnand %p602_p13, %p601_p12 }
  0x1b   : > { %p604_p3 = pneg %p603_p0 }
  0x1d   : > { %p609_p7 = pnand %p607_p5, %p604_p3 }
  0x1f   : > { %612 = shalt.err (!%p609_p7)
}
  0x20   : > { %s613_s9 = scalar_lea.vmem %s154_s26, 256  ;;  %p621_p1 = scmp.lt.s32.totalorder %s154_s26, %s154_s26 }
  0x21   : > { %p614_p9 = scmp.ne.s32.totalorder %s154_s26, %s613_s9  ;;  %p622_p4 = scmp.lt.s32.totalorder %s613_s9, %s613_s9 }
  0x23   : > { %p616_p10 = pnand %p614_p9, %p602_p13  ;;  %p623_p8 = por %p622_p4, %p621_p1 }
  0x25   : > { %p617_p6 = pneg %p616_p10 }
  0x27   : > { %p624_p2 = pnand %p623_p8, %p617_p6 }
  0x29   : > { %627 = shalt.err (!%p624_p2)
}
  0x2a   : > { %s747_s10 = smov 64   ;;  %s748_s11 = smov 4  }
  0x2b   : > { %514 = dma.hbm_to_vmem [thread:$0]  (!%p837_p11), %s998_s1, 256, %s154_s26, [#allocation8], %s747_s10, %s747_s10, %s748_s11  }
  0x2c   : > { %p34_p1 = scmp.ge.s32.totalorder %s32_s28, 2  ;;  %s41_s25 = sadd.s32 1, %s732_s14 }
  0x2d   : > { %p48_p2 = scmp.ne.s32.totalorder %s732_s14, %s728_s13  ;;  %p49_p4 = scmp.eq.s32.totalorder %s744_s17, 0 }
  0x2e   : > { %s1026_s28 = smov (%p34_p1, %s32_s28), 0  ;;  %p1012_p8 = scmp.ne.s32.totalorder %s1006_s21, 0 }
  0x2f   : > { %p864_p6 = por %p49_p4, %p48_p2  ;;  %s36_s27 = ssub.s32 %s740_s16, %s1026_s28 }
  0x30   : > { %p870_p10 = por %p1012_p8, %p48_p2  ;;  %p524_p12 = scmp.lt.s32.totalorder %s744_s17, 2 }
  0x31   : > { %p39_p11 = scmp.eq.s32.totalorder %s36_s27, 0  ;;  %s170_s26 = sand.u32 1, %s732_s14  }
  0x32   : > { %s478_s4 = sshll.u32 %s170_s26, 3  ;;  %s479_s6 = sshll.u32 %s740_s16, 7 }
  0x33   : > { %s879_s5 = scalar_select %p39_p11, %s732_s14, %s41_s25  }
  0x34   : > { %s885_s9 = scalar_lea.hbm %s997_s0, %s479_s6  ;;  %s174_s21 = scalar_lea.vmem [#allocation4], %s478_s4 }
  0x35   : > { %s182_s10 = sshll.u32 %s174_s21, 4  ;;  %p891_p13 = pnand %p524_p12, %p864_p6  ;;  %s887_s10 = int_to_ptr.vmem [resolvable:$true] %s182_s10 }
  0x36   : > { %s171_s18 = scalar_lea.sflag [#allocation5], %s170_s26  ;;  %s628_s19 = scalar_lea.hbm %s885_s9, 128 }
  0x37   : > { %p629_p0 = scmp.ne.s32.totalorder %s885_s9, %s628_s19  ;;  %p630_p3 = pneg %p891_p13 }
  0x38   : > { %s633_s4 = scalar_lea.hbm %s997_s0, 256  ;;  %p634_p9 = scmp.lt.u32.totalorder %s885_s9, %s997_s0 }
  0x39   : > { %p631_p5 = pnand %p630_p3, %p629_p0  ;;  %p635_p1 = scmp.lt.u32.totalorder %s633_s4, %s628_s19 }
  0x3a   : > { %p637_p4 = scmp.lt.u32.totalorder %s628_s19, %s885_s9 }
  0x3b   : > { %p632_p7 = pneg %p631_p5  ;;  %p636_p2 = por %p635_p1, %p634_p9 }
  0x3d   : > { %p638_p6 = por %p637_p4, %p636_p2 }
  0x3f   : > { %p639_p8 = pnand %p638_p6, %p632_p7 }
  0x41   : > { %642 = shalt.err (!%p639_p8)
}
  0x42   : > { %s643_s26 = scalar_lea.vmem %s887_s10, 128  ;;  %s749_s7 = smov [#allocation4]  }
  0x43   : > { %p644_p12 = scmp.ne.s32.totalorder %s887_s10, %s643_s26  ;;  %s648_s8 = sshll.u32 %s749_s7, 4  ;;  %s649_s8 = int_to_ptr.vmem [resolvable:$false] %s648_s8 }
  0x44   : > { %s650_s21 = scalar_lea.vmem %s649_s8, 256  ;;  %p651_p5 = scmp.lt.s32.totalorder %s887_s10, %s649_s8 }
  0x45   : > { %p646_p11 = pnand %p644_p12, %p630_p3  ;;  %p652_p9 = scmp.lt.s32.totalorder %s650_s21, %s643_s26 }
  0x47   : > { %p647_p0 = pneg %p646_p11  ;;  %p653_p1 = por %p652_p9, %p651_p5 }
  0x49   : > { %p654_p2 = pnand %p653_p1, %p647_p0 }
  0x4b   : > { %657 = shalt.err (!%p654_p2)
}
  0x4c   : > { %518 = dma.hbm_to_vmem [thread:$0]  (!%p891_p13), %s885_s9, 128, %s887_s10, %s171_s18  }
  0x4d   : > { %p1015_p7 = scmp.ne.s32.totalorder %s1009_s24, 0 }
  0x4e   : > { %s923_s19 = sand.u32 (!%p1015_p7), 1, %s728_s13   ;;  %p1016_p3 = scmp.ne.s32.totalorder (!%p1015_p7), %s1007_s22, 0 }
  0x4f   : > { %191 = sbr.rel (%p1015_p7) target bundleno = 644 (0x284), region = 32  ;;  %s481_s25 = sshll.u32 (!%p1015_p7), %s923_s19, 3 }
  0x50   : > { %s194_s27 = scalar_lea.sflag (!%p1015_p7), [#allocation5], %s923_s19  ;;  %s197_s4 = scalar_lea.vmem (!%p1015_p7), [#allocation4], %s481_s25 }
  0x56   : > { %711 = dma.done.wait (%p1016_p3), %s194_s27, 128  }
  0x57   : > { %713 = vsyncadd (%p1016_p3), %s194_s27, 4294967168  ;;  %p1017_p13 = scmp.ne.s32.totalorder %s1005_s20, 0 }
  0x59   : > { %715 = dma.done.wait (%p1017_p13), [#allocation8], 256  }
  0x5a   : > { %717 = vsyncadd (%p1017_p13), [#allocation8], 4294967040  ;;  %vm231_vm0 = vcmask 7168   ;;  %v750_v0 = vmov 0.0   ;;  %vm751_vm1 = vmmov 0   ;;  %v233_v1 = vld [vmem:[%s197_s4] sm:$0xff] }
  0x5b   : > { %232 = vst.msk [vmem:[#allocation3] sm:$0xff] %vm231_vm0, %v750_v0  ;;  %495 = vmatprep.subr.bf16.mxu0 %v750_v0  ;;  %499 = vmatprep.mubr.msk.bf16.mxu0 %vm751_vm1, %v750_v0  ;;  %vm236_vm2 = vcmask 261120   ;;  %v235_v2 = vmul.f32 %v233_v1, %v233_v1  ;;  %v582_v3 = vld [vmem:[#allocation7] sm:$0xff]   ;;  %v583_v5 = vld [vmem:[#allocation7 + $0x8] sm:$0xff]   ;;  %v244_v6 = vpack.c.bf16 %v233_v1, %v233_v1  ;;  %v752_v7 = vmov 0   ;;  %s489_s24 = sshll.u32 %s736_s15, 7 }
  0x5c   : > { %496 = vmatpush3.bf16.msra.mxu0 %v582_v3  ;;  %581 = vset.pattern.permute.xlu0 %v752_v7  ;;  %v487_v40 = vld [vmem:[%s999_s2] ss:$0 sm:$0xff]  ;;  %s223_s9 = scalar_lea.vmem [#allocation9], %s481_s25  ;;  %s948_s29 = scalar_lea.hbm %s1000_s3, %s489_s24 }
  0x5d   : > { %v237_v4 = vsel %vm236_vm2, %v235_v2, 0.0  ;;  %497 = vmatprep.subr.bf16.mxu0 %v750_v0  ;;  %s382_s10 = sshll.u32 %s223_s9, 4  ;;  %s369_s6 = scalar_lea.sflag [#allocation6], %s923_s19  ;;  %s950_s10 = int_to_ptr.vmem [resolvable:$true] %s382_s10 }
  0x5e   : > { %238 = vadd.xlane.f32.xlu0 %v237_v4  ;;  %s658_s26 = scalar_lea.vmem %s950_s10, 128  ;;  %s753_s15 = smov [#allocation9]  }
  0x5f   : > { %p659_p4 = scmp.ne.s32.totalorder %s950_s10, %s658_s26  ;;  %s662_s7 = sshll.u32 %s753_s15, 4  ;;  %s663_s7 = int_to_ptr.vmem [resolvable:$false] %s662_s7 }
  0x60   : > { %498 = vmatpush3.bf16.msra.mxu0 %v583_v5  ;;  %s664_s8 = scalar_lea.vmem %s663_s7, 256  ;;  %p665_p12 = scmp.lt.s32.totalorder %s950_s10, %s663_s7 }
  0x61   : > { %p660_p6 = pnand %p659_p4, %p870_p10  ;;  %p666_p11 = scmp.lt.s32.totalorder %s664_s8, %s658_s26 }
  0x62   : > { %v234_v8 = vld [vmem:[#allocation3] sm:$0xff] }
  0x63   : > { %500 = vmatmul.mubr.msk.bf16.vlgmr.msra.gmra.mrb[0].mxu0 %vm236_vm2, %v244_v6  ;;  %p661_p8 = pneg %p660_p6  ;;  %p667_p0 = por %p666_p11, %p665_p12 }
  0x65   : > { %p668_p5 = pnand %p667_p0, %p661_p8 }
  0xeb   : > { %v239_v9 = vpop.xlane.xlu0 %238 }
  0xec   : > { %v240_v10 = vadd.f32 %v239_v9, %v234_v8 }
  0xee   : > { %242 = vst.msk [vmem:[#allocation3] sm:$0xff] %vm231_vm0, %v240_v10 }
  0xf5   : > { %v309_v11 = vld [vmem:[#allocation3] sm:$0xff] }
  0xf6   : > { %584 = vrsqrt.f32 %v309_v11  ;;  %vm312_vm3 = vcmp.eq.f32.partialorder %v309_v11, inf  ;;  %v315_v14 = vand.u32 2147483648, %v309_v11  ;;  %vm314_vm4 = vcmp.eq.f32.partialorder %v309_v11, 0.0 }
 0x100   : > { %v585_v12 = vpop.eup %584 }
 0x101   : > { %v311_v13 = vmul.f32 %v585_v12, %v309_v11 }
 0x103   : > { %v313_v15 = vsel %vm312_vm3, %v309_v11, %v311_v13 }
 0x104   : > { %v316_v16 = vsel %vm314_vm4, %v315_v14, %v313_v15 }
 0x105   : > { %v318_v17 = vmax.f32 %v316_v16, 1e-05  ;;  %vm317_vm5 = vcmp.gt.f32.partialorder %v316_v16, 0.99999 }
 0x107   : > { %586 = vrcp.f32 %v318_v17 }
 0x111   : > { %v587_v18 = vpop.eup %586 }
 0x112   : > { %v320_v19 = vmul.f32 0.99999, %v587_v18 }
 0x114   : > { %v321_v20 = vsel %vm317_vm5, %v320_v19, 1.0 }
 0x115   : > { %v322_v21 = vmul.f32 %v321_v20, %v316_v16 }
 0x117   : > { %v323_v22 = vmax.f32 %v322_v21, 1e-05 }
 0x119   : > { %v324_v23 = vmin.f32 %v323_v22, 0.99999 }
 0x11b   : > { %v325_v24 = vmin.f32 %v324_v23, 0.99999 }
 0x11d   : > { %v327_v25 = vsub.f32 1.0, %v325_v24  ;;  %v326_v26 = vadd.f32 1.0, %v325_v24 }
 0x11f   : > { %588 = vrcp.f32 %v327_v25 }
 0x129   : > { %v589_v27 = vpop.eup %588 }
 0x12a   : > { %v329_v28 = vmul.f32 %v589_v27, %v326_v26 }
 0x12c   : > { %590 = vlog2.f32 %v329_v28 }
 0x12d   : > { %592 = vrcp.f32 %v324_v23 }
 0x136   : > { %v591_v29 = vpop.eup %590  ;;  %v298_v31 = vpop.f32.mrb[0].mxu0 }
 0x137   : > { %v331_v30 = vmul.f32 0.6931472, %v591_v29  ;;  %v501_v32 = vpop.f32.mrb[1].mxu0  ;;  %v593_v35 = vpop.eup %592 }
 0x138   : > { %v301_v34 = vpop.f32.mrb[2].mxu0 }
 0x139   : > { %v332_v33 = vmul.f32 0.5, %v331_v30  ;;  %v502_v36 = vpop.f32.mrb[3].mxu0 }
 0x13b   : > { %v334_v37 = vmul.f32 %v593_v35, %v332_v33 }
 0x13d   : > { %v335_v38 = vmul.f32 %v334_v37, %v321_v20 }
 0x13f   : > { %339 = vperm.xlu0 %581, %v335_v38  }
 0x1be   : > { %v340_v39 = vpop.permute.xlu0 %339 }
 0x1bf   : > { %v342_v41 = vmul.f32 %v340_v39, %v298_v31 }
 0x1c1   : > { %v350_v42 = vadd.f32 %v487_v40, %v342_v41 }
 0x1c3   : > { %v351_v43 = vmul.f32 %v350_v42, %v350_v42 }
 0x1c5   : > { %352 = vadd.xlane.f32.xlu1 %v351_v43 }
 0x252   : > { %v353_v44 = vpop.xlane.xlu1 %352 }
 0x253   : > { %594 = vrsqrt.f32 %v353_v44  ;;  %vm356_vm6 = vcmp.eq.f32.partialorder %v353_v44, inf  ;;  %v359_v47 = vand.u32 2147483648, %v353_v44  ;;  %vm358_vm7 = vcmp.eq.f32.partialorder %v353_v44, 0.0 }
 0x25d   : > { %v595_v45 = vpop.eup %594 }
 0x25e   : > { %v355_v46 = vmul.f32 %v595_v45, %v353_v44 }
 0x260   : > { %v357_v48 = vsel %vm356_vm6, %v353_v44, %v355_v46 }
 0x261   : > { %v360_v49 = vsel %vm358_vm7, %v359_v47, %v357_v48 }
 0x262   : > { %v361_v50 = vmax.f32 %v360_v49, 1e-05 }
 0x264   : > { %v362_v51 = vmin.f32 %v361_v50, 0.90909094 }
 0x266   : > { %596 = vtanh.f32 %v362_v51 }
 0x267   : > { %598 = vrcp.f32 %v362_v51 }
 0x270   : > { %v597_v52 = vpop.eup %596 }
 0x271   : > { %v599_v53 = vpop.eup %598 }
 0x272   : > { %v365_v54 = vmul.f32 %v599_v53, %v597_v52 }
 0x274   : > { %v366_v55 = vmul.f32 %v365_v54, %v350_v42 }
 0x276   : > { %367 = vst [vmem:[%s223_s9] sm:$0xff] %v366_v55 }
 0x277   : > { %671 = shalt.err (!%p668_p5)
}
 0x278   : > { %s672_s21 = scalar_lea.hbm %s948_s29, 128  ;;  %s676_s27 = scalar_lea.hbm %s1000_s3, 256 }
 0x279   : > { %p673_p9 = scmp.ne.s32.totalorder %s948_s29, %s672_s21  ;;  %p677_p7 = scmp.lt.u32.totalorder %s948_s29, %s1000_s3 }
 0x27a   : > { %p678_p3 = scmp.lt.u32.totalorder %s676_s27, %s672_s21  ;;  %p680_p4 = scmp.lt.u32.totalorder %s672_s21, %s948_s29 }
 0x27b   : > { %p674_p1 = pnand %p673_p9, %p870_p10 }
 0x27c   : > { %p679_p13 = por %p678_p3, %p677_p7 }
 0x27d   : > { %p675_p2 = pneg %p674_p1 }
 0x27e   : > { %p681_p6 = por %p680_p4, %p679_p13 }
 0x280   : > { %p682_p8 = pnand %p681_p6, %p675_p2 }
 0x282   : > { %685 = shalt.err (!%p682_p8)
}
 0x283   : > { %509 = dma.vmem_to_hbm [thread:$0]  (%p870_p10), %s950_s10, 128, %s948_s29, %s369_s6  }
 0x284 PF: > { %s394_s22 = sand.u32 1, %s724_s12   ;;  %p1018_p12 = scmp.ne.s32.totalorder %s1008_s23, 0 }
 0x285   : > { %p1019_p11 = scmp.ge.s32.totalorder %s744_s17, 2  ;;  %s395_s24 = scalar_lea.sflag [#allocation6], %s394_s22 }
 0x287   : > { %p520_p0 = pnand %p1019_p11, %p1018_p12 }
 0x289   : > { %719 = dma.done.wait (!%p520_p0), %s395_s24, 128  }
 0x28a   : > { %721 = vsyncadd (!%p520_p0), %s395_s24, 4294967168  ;;  %s20_s17 = sadd.s32 1, %s744_s17   ;;  %s1020_s12 = smov %s728_s13 }
 0x28b   : > { %p17_p5 = scmp.ge.s32.totalorder %s20_s17, 4   ;;  %s1021_s13 = smov %s732_s14 }
 0x28c   : > { %s1022_s14 = smov %s879_s5  ;;  %s1023_s15 = smov %s740_s16 }
 0x28d   : > { %s1024_s16 = smov %s1026_s28  ;;  %19 = sbr.rel (!%p17_p5) target bundleno = 7 (0x7), region = 90 }
 0x294   :  { %400 = vsyncpa [#allocation5], 1 }
 0x295   :  { %402 = vsyncpa [#allocation5 + $0x1], 1 }
 0x296   :  { %403 = vsyncpa [#allocation8], 1 }
 0x297   :  { %404 = vsyncpa [#allocation6], 1 }
 0x298   :  { %406 = vsyncpa [#allocation6 + $0x1], 1 }

// kernel: tpu_custom_call.1
= control target key start
LH: loop header
LB: loop body
LE: loop exit
PB: predicated region body
PF: predicated region fallthrough
CT: control target
= control target key end

     0   :  { %8 = vsyncpa [#allocation5], 0  ;;  %s997_s0 = inlined_call_operand.hbm [shape: f32[16,32], index: 0, kind: input, shape index: {}]   ;;  %s998_s1 = inlined_call_operand.hbm [shape: bf16[32,128], index: 1, kind: input, shape index: {}]   ;;  %s999_s2 = inlined_call_operand.vmem [shape: f32[1,128], index: 2, kind: input, shape index: {}]   ;;  %s1000_s3 = inlined_call_operand.hbm [shape: f32[16,128], index: 3, kind: output, shape index: {}]  }
   0x1   :  { %10 = vsyncpa [#allocation5 + $0x1], 0 }
   0x2   :  { %11 = vsyncpa [#allocation8], 0 }
   0x3   :  { %12 = vsyncpa [#allocation6], 0 }
   0x4   :  { %14 = vsyncpa [#allocation6 + $0x1], 0  ;;  %s774_s12 = smov 0   ;;  %s776_s13 = smov 0  }
   0x5   :  { %s778_s14 = smov 0   ;;  %s780_s15 = smov 0  }
   0x6   :  { %s782_s16 = smov 0   ;;  %s784_s17 = smov 0  }
   0x7 LB: > { %s473_s18 = sadd.s32 4294967295, %s744_s17   ;;  %s474_s19 = sadd.s32 4294967294, %s744_s17   ;;  %s744_s17 = sphi %s784_s17, %s20_s17   ;;  %s740_s16 = sphi %s782_s16, %s1024_s16   ;;  %s736_s15 = sphi %s780_s15, %s1023_s15   ;;  %s732_s14 = sphi %s778_s14, %s1022_s14   ;;  %s728_s13 = sphi %s776_s13, %s1021_s13   ;;  %s724_s12 = sphi %s774_s12, %s1020_s12  }
   0x8   : > { %p54_p0 = scmp.ne.s32.totalorder %s728_s13, %s724_s12  ;;  %p808_p1 = scmp.eq.s32.totalorder %s473_s18, 0 }
   0x9   : > { %p812_p2 = scmp.eq.s32.totalorder %s473_s18, 1  ;;  %p131_p3 = scmp.eq.s32.totalorder %s474_s19, 1 }
   0xa   : > { %s1005_s20 = scalar_select %p808_p1, 1, 0 }
   0xb   : > { %s1006_s21 = scalar_select %p812_p2, 1, 0 }
   0xc   : > { %p818_p4 = por %p808_p1, %p54_p0  ;;  %p475_p5 = scmp.ge.s32.totalorder %s744_s17, 1 }
   0xd   : > { %p823_p6 = por %p131_p3, %p54_p0  ;;  %p138_p7 = scmp.lt.s32.totalorder %s744_s17, 3 }
   0xe   : > { %s1007_s22 = scalar_select %p818_p4, 1, 0 }
   0xf   : > { %s1008_s23 = scalar_select %p823_p6, 1, 0 }
  0x10   : > { %p828_p8 = pnand %p475_p5, %p138_p7  ;;  %s746_s25 = smov [#allocation7]  }
  0x11   : > { %s153_s26 = sshll.u32 %s746_s25, 4  ;;  %s32_s28 = sadd.s32 1, %s740_s16  ;;  %s154_s26 = int_to_ptr.vmem [resolvable:$true] %s153_s26 }
  0x12   : > { %s1009_s24 = scalar_select %p828_p8, 1, 0 }
  0x13   : > { %p511_p9 = pneg %p828_p8  ;;  %s600_s4 = scalar_lea.hbm %s998_s1, 256 }
  0x14   : > { %p601_p12 = scmp.ne.s32.totalorder %s998_s1, %s600_s4  ;;  %p607_p5 = scmp.lt.u32.totalorder %s600_s4, %s998_s1 }
  0x15   : > { %p837_p11 = pnand %p511_p9, %p808_p1 }
  0x17   : > { %p602_p13 = pneg %p837_p11 }
  0x19   : > { %p603_p0 = pnand %p602_p13, %p601_p12 }
  0x1b   : > { %p604_p3 = pneg %p603_p0 }
  0x1d   : > { %p609_p7 = pnand %p607_p5, %p604_p3 }
  0x1f   : > { %612 = shalt.err (!%p609_p7)
}
  0x20   : > { %s613_s9 = scalar_lea.vmem %s154_s26, 256  ;;  %p621_p1 = scmp.lt.s32.totalorder %s154_s26, %s154_s26 }
  0x21   : > { %p614_p9 = scmp.ne.s32.totalorder %s154_s26, %s613_s9  ;;  %p622_p4 = scmp.lt.s32.totalorder %s613_s9, %s613_s9 }
  0x23   : > { %p616_p10 = pnand %p614_p9, %p602_p13  ;;  %p623_p8 = por %p622_p4, %p621_p1 }
  0x25   : > { %p617_p6 = pneg %p616_p10 }
  0x27   : > { %p624_p2 = pnand %p623_p8, %p617_p6 }
  0x29   : > { %627 = shalt.err (!%p624_p2)
}
  0x2a   : > { %s747_s10 = smov 64   ;;  %s748_s11 = smov 4  }
  0x2b   : > { %514 = dma.hbm_to_vmem [thread:$0]  (!%p837_p11), %s998_s1, 256, %s154_s26, [#allocation8], %s747_s10, %s747_s10, %s748_s11  }
  0x2c   : > { %p34_p1 = scmp.ge.s32.totalorder %s32_s28, 2  ;;  %s41_s25 = sadd.s32 1, %s732_s14 }
  0x2d   : > { %p48_p2 = scmp.ne.s32.totalorder %s732_s14, %s728_s13  ;;  %p49_p4 = scmp.eq.s32.totalorder %s744_s17, 0 }
  0x2e   : > { %s1026_s28 = smov (%p34_p1, %s32_s28), 0  ;;  %p1012_p8 = scmp.ne.s32.totalorder %s1006_s21, 0 }
  0x2f   : > { %p864_p6 = por %p49_p4, %p48_p2  ;;  %s36_s27 = ssub.s32 %s740_s16, %s1026_s28 }
  0x30   : > { %p870_p10 = por %p1012_p8, %p48_p2  ;;  %p524_p12 = scmp.lt.s32.totalorder %s744_s17, 2 }
  0x31   : > { %p39_p11 = scmp.eq.s32.totalorder %s36_s27, 0  ;;  %s170_s26 = sand.u32 1, %s732_s14  }
  0x32   : > { %s478_s4 = sshll.u32 %s170_s26, 3  ;;  %s479_s6 = sshll.u32 %s740_s16, 7 }
  0x33   : > { %s879_s5 = scalar_select %p39_p11, %s732_s14, %s41_s25  }
  0x34   : > { %s885_s9 = scalar_lea.hbm %s997_s0, %s479_s6  ;;  %s174_s21 = scalar_lea.vmem [#allocation4], %s478_s4 }
  0x35   : > { %s182_s10 = sshll.u32 %s174_s21, 4  ;;  %p891_p13 = pnand %p524_p12, %p864_p6  ;;  %s887_s10 = int_to_ptr.vmem [resolvable:$true] %s182_s10 }
  0x36   : > { %s171_s18 = scalar_lea.sflag [#allocation5], %s170_s26  ;;  %s628_s19 = scalar_lea.hbm %s885_s9, 128 }
  0x37   : > { %p629_p0 = scmp.ne.s32.totalorder %s885_s9, %s628_s19  ;;  %p630_p3 = pneg %p891_p13 }
  0x38   : > { %s633_s4 = scalar_lea.hbm %s997_s0, 256  ;;  %p634_p9 = scmp.lt.u32.totalorder %s885_s9, %s997_s0 }
  0x39   : > { %p631_p5 = pnand %p630_p3, %p629_p0  ;;  %p635_p1 = scmp.lt.u32.totalorder %s633_s4, %s628_s19 }
  0x3a   : > { %p637_p4 = scmp.lt.u32.totalorder %s628_s19, %s885_s9 }
  0x3b   : > { %p632_p7 = pneg %p631_p5  ;;  %p636_p2 = por %p635_p1, %p634_p9 }
  0x3d   : > { %p638_p6 = por %p637_p4, %p636_p2 }
  0x3f   : > { %p639_p8 = pnand %p638_p6, %p632_p7 }
  0x41   : > { %642 = shalt.err (!%p639_p8)
}
  0x42   : > { %s643_s26 = scalar_lea.vmem %s887_s10, 128  ;;  %s749_s7 = smov [#allocation4]  }
  0x43   : > { %p644_p12 = scmp.ne.s32.totalorder %s887_s10, %s643_s26  ;;  %s648_s8 = sshll.u32 %s749_s7, 4  ;;  %s649_s8 = int_to_ptr.vmem [resolvable:$false] %s648_s8 }
  0x44   : > { %s650_s21 = scalar_lea.vmem %s649_s8, 256  ;;  %p651_p5 = scmp.lt.s32.totalorder %s887_s10, %s649_s8 }
  0x45   : > { %p646_p11 = pnand %p644_p12, %p630_p3  ;;  %p652_p9 = scmp.lt.s32.totalorder %s650_s21, %s643_s26 }
  0x47   : > { %p647_p0 = pneg %p646_p11  ;;  %p653_p1 = por %p652_p9, %p651_p5 }
  0x49   : > { %p654_p2 = pnand %p653_p1, %p647_p0 }
  0x4b   : > { %657 = shalt.err (!%p654_p2)
}
  0x4c   : > { %518 = dma.hbm_to_vmem [thread:$0]  (!%p891_p13), %s885_s9, 128, %s887_s10, %s171_s18  }
  0x4d   : > { %p1015_p7 = scmp.ne.s32.totalorder %s1009_s24, 0 }
  0x4e   : > { %s923_s19 = sand.u32 (!%p1015_p7), 1, %s728_s13   ;;  %p1016_p3 = scmp.ne.s32.totalorder (!%p1015_p7), %s1007_s22, 0 }
  0x4f   : > { %191 = sbr.rel (%p1015_p7) target bundleno = 644 (0x284), region = 32  ;;  %s481_s25 = sshll.u32 (!%p1015_p7), %s923_s19, 3 }
  0x50   : > { %s194_s27 = scalar_lea.sflag (!%p1015_p7), [#allocation5], %s923_s19  ;;  %s197_s4 = scalar_lea.vmem (!%p1015_p7), [#allocation4], %s481_s25 }
  0x56   : > { %711 = dma.done.wait (%p1016_p3), %s194_s27, 128  }
  0x57   : > { %713 = vsyncadd (%p1016_p3), %s194_s27, 4294967168  ;;  %p1017_p13 = scmp.ne.s32.totalorder %s1005_s20, 0 }
  0x59   : > { %715 = dma.done.wait (%p1017_p13), [#allocation8], 256  }
  0x5a   : > { %717 = vsyncadd (%p1017_p13), [#allocation8], 4294967040  ;;  %vm231_vm0 = vcmask 7168   ;;  %v750_v0 = vmov 0.0   ;;  %vm751_vm1 = vmmov 0   ;;  %v233_v1 = vld [vmem:[%s197_s4] sm:$0xff] }
  0x5b   : > { %232 = vst.msk [vmem:[#allocation3] sm:$0xff] %vm231_vm0, %v750_v0  ;;  %495 = vmatprep.subr.bf16.mxu0 %v750_v0  ;;  %499 = vmatprep.mubr.msk.bf16.mxu0 %vm751_vm1, %v750_v0  ;;  %vm236_vm2 = vcmask 261120   ;;  %v235_v2 = vmul.f32 %v233_v1, %v233_v1  ;;  %v582_v3 = vld [vmem:[#allocation7] sm:$0xff]   ;;  %v583_v5 = vld [vmem:[#allocation7 + $0x8] sm:$0xff]   ;;  %v244_v6 = vpack.c.bf16 %v233_v1, %v233_v1  ;;  %v752_v7 = vmov 0   ;;  %s489_s24 = sshll.u32 %s736_s15, 7 }
  0x5c   : > { %496 = vmatpush3.bf16.msra.mxu0 %v582_v3  ;;  %581 = vset.pattern.permute.xlu0 %v752_v7  ;;  %v487_v40 = vld [vmem:[%s999_s2] ss:$0 sm:$0xff]  ;;  %s223_s9 = scalar_lea.vmem [#allocation9], %s481_s25  ;;  %s948_s29 = scalar_lea.hbm %s1000_s3, %s489_s24 }
  0x5d   : > { %v237_v4 = vsel %vm236_vm2, %v235_v2, 0.0  ;;  %497 = vmatprep.subr.bf16.mxu0 %v750_v0  ;;  %s382_s10 = sshll.u32 %s223_s9, 4  ;;  %s369_s6 = scalar_lea.sflag [#allocation6], %s923_s19  ;;  %s950_s10 = int_to_ptr.vmem [resolvable:$true] %s382_s10 }
  0x5e   : > { %238 = vadd.xlane.f32.xlu0 %v237_v4  ;;  %s658_s26 = scalar_lea.vmem %s950_s10, 128  ;;  %s753_s15 = smov [#allocation9]  }
  0x5f   : > { %p659_p4 = scmp.ne.s32.totalorder %s950_s10, %s658_s26  ;;  %s662_s7 = sshll.u32 %s753_s15, 4  ;;  %s663_s7 = int_to_ptr.vmem [resolvable:$false] %s662_s7 }
  0x60   : > { %498 = vmatpush3.bf16.msra.mxu0 %v583_v5  ;;  %s664_s8 = scalar_lea.vmem %s663_s7, 256  ;;  %p665_p12 = scmp.lt.s32.totalorder %s950_s10, %s663_s7 }
  0x61   : > { %p660_p6 = pnand %p659_p4, %p870_p10  ;;  %p666_p11 = scmp.lt.s32.totalorder %s664_s8, %s658_s26 }
  0x62   : > { %v234_v8 = vld [vmem:[#allocation3] sm:$0xff] }
  0x63   : > { %500 = vmatmul.mubr.msk.bf16.vlgmr.msra.gmra.mrb[0].mxu0 %vm236_vm2, %v244_v6  ;;  %p661_p8 = pneg %p660_p6  ;;  %p667_p0 = por %p666_p11, %p665_p12 }
  0x65   : > { %p668_p5 = pnand %p667_p0, %p661_p8 }
  0xeb   : > { %v239_v9 = vpop.xlane.xlu0 %238 }
  0xec   : > { %v240_v10 = vadd.f32 %v239_v9, %v234_v8 }
  0xee   : > { %242 = vst.msk [vmem:[#allocation3] sm:$0xff] %vm231_vm0, %v240_v10 }
  0xf5   : > { %v309_v11 = vld [vmem:[#allocation3] sm:$0xff] }
  0xf6   : > { %584 = vrsqrt.f32 %v309_v11  ;;  %vm312_vm3 = vcmp.eq.f32.partialorder %v309_v11, inf  ;;  %v315_v14 = vand.u32 2147483648, %v309_v11  ;;  %vm314_vm4 = vcmp.eq.f32.partialorder %v309_v11, 0.0 }
 0x100   : > { %v585_v12 = vpop.eup %584 }
 0x101   : > { %v311_v13 = vmul.f32 %v585_v12, %v309_v11 }
 0x103   : > { %v313_v15 = vsel %vm312_vm3, %v309_v11, %v311_v13 }
 0x104   : > { %v316_v16 = vsel %vm314_vm4, %v315_v14, %v313_v15 }
 0x105   : > { %v318_v17 = vmax.f32 %v316_v16, 1e-05  ;;  %vm317_vm5 = vcmp.gt.f32.partialorder %v316_v16, 0.99999 }
 0x107   : > { %586 = vrcp.f32 %v318_v17 }
 0x111   : > { %v587_v18 = vpop.eup %586 }
 0x112   : > { %v320_v19 = vmul.f32 0.99999, %v587_v18 }
 0x114   : > { %v321_v20 = vsel %vm317_vm5, %v320_v19, 1.0 }
 0x115   : > { %v322_v21 = vmul.f32 %v321_v20, %v316_v16 }
 0x117   : > { %v323_v22 = vmax.f32 %v322_v21, 1e-05 }
 0x119   : > { %v324_v23 = vmin.f32 %v323_v22, 0.99999 }
 0x11b   : > { %v325_v24 = vmin.f32 %v324_v23, 0.99999 }
 0x11d   : > { %v327_v25 = vsub.f32 1.0, %v325_v24  ;;  %v326_v26 = vadd.f32 1.0, %v325_v24 }
 0x11f   : > { %588 = vrcp.f32 %v327_v25 }
 0x129   : > { %v589_v27 = vpop.eup %588 }
 0x12a   : > { %v329_v28 = vmul.f32 %v589_v27, %v326_v26 }
 0x12c   : > { %590 = vlog2.f32 %v329_v28 }
 0x12d   : > { %592 = vrcp.f32 %v324_v23 }
 0x136   : > { %v591_v29 = vpop.eup %590  ;;  %v298_v31 = vpop.f32.mrb[0].mxu0 }
 0x137   : > { %v331_v30 = vmul.f32 0.6931472, %v591_v29  ;;  %v501_v32 = vpop.f32.mrb[1].mxu0  ;;  %v593_v35 = vpop.eup %592 }
 0x138   : > { %v301_v34 = vpop.f32.mrb[2].mxu0 }
 0x139   : > { %v332_v33 = vmul.f32 0.5, %v331_v30  ;;  %v502_v36 = vpop.f32.mrb[3].mxu0 }
 0x13b   : > { %v334_v37 = vmul.f32 %v593_v35, %v332_v33 }
 0x13d   : > { %v335_v38 = vmul.f32 %v334_v37, %v321_v20 }
 0x13f   : > { %339 = vperm.xlu0 %581, %v335_v38  }
 0x1be   : > { %v340_v39 = vpop.permute.xlu0 %339 }
 0x1bf   : > { %v342_v41 = vmul.f32 %v340_v39, %v298_v31 }
 0x1c1   : > { %v350_v42 = vadd.f32 %v487_v40, %v342_v41 }
 0x1c3   : > { %v351_v43 = vmul.f32 %v350_v42, %v350_v42 }
 0x1c5   : > { %352 = vadd.xlane.f32.xlu1 %v351_v43 }
 0x252   : > { %v353_v44 = vpop.xlane.xlu1 %352 }
 0x253   : > { %594 = vrsqrt.f32 %v353_v44  ;;  %vm356_vm6 = vcmp.eq.f32.partialorder %v353_v44, inf  ;;  %v359_v47 = vand.u32 2147483648, %v353_v44  ;;  %vm358_vm7 = vcmp.eq.f32.partialorder %v353_v44, 0.0 }
 0x25d   : > { %v595_v45 = vpop.eup %594 }
 0x25e   : > { %v355_v46 = vmul.f32 %v595_v45, %v353_v44 }
 0x260   : > { %v357_v48 = vsel %vm356_vm6, %v353_v44, %v355_v46 }
 0x261   : > { %v360_v49 = vsel %vm358_vm7, %v359_v47, %v357_v48 }
 0x262   : > { %v361_v50 = vmax.f32 %v360_v49, 1e-05 }
 0x264   : > { %v362_v51 = vmin.f32 %v361_v50, 0.90909094 }
 0x266   : > { %596 = vtanh.f32 %v362_v51 }
 0x267   : > { %598 = vrcp.f32 %v362_v51 }
 0x270   : > { %v597_v52 = vpop.eup %596 }
 0x271   : > { %v599_v53 = vpop.eup %598 }
 0x272   : > { %v365_v54 = vmul.f32 %v599_v53, %v597_v52 }
 0x274   : > { %v366_v55 = vmul.f32 %v365_v54, %v350_v42 }
 0x276   : > { %367 = vst [vmem:[%s223_s9] sm:$0xff] %v366_v55 }
 0x277   : > { %671 = shalt.err (!%p668_p5)
}
 0x278   : > { %s672_s21 = scalar_lea.hbm %s948_s29, 128  ;;  %s676_s27 = scalar_lea.hbm %s1000_s3, 256 }
 0x279   : > { %p673_p9 = scmp.ne.s32.totalorder %s948_s29, %s672_s21  ;;  %p677_p7 = scmp.lt.u32.totalorder %s948_s29, %s1000_s3 }
 0x27a   : > { %p678_p3 = scmp.lt.u32.totalorder %s676_s27, %s672_s21  ;;  %p680_p4 = scmp.lt.u32.totalorder %s672_s21, %s948_s29 }
 0x27b   : > { %p674_p1 = pnand %p673_p9, %p870_p10 }
 0x27c   : > { %p679_p13 = por %p678_p3, %p677_p7 }
 0x27d   : > { %p675_p2 = pneg %p674_p1 }
 0x27e   : > { %p681_p6 = por %p680_p4, %p679_p13 }
 0x280   : > { %p682_p8 = pnand %p681_p6, %p675_p2 }
 0x282   : > { %685 = shalt.err (!%p682_p8)
}
 0x283   : > { %509 = dma.vmem_to_hbm [thread:$0]  (%p870_p10), %s950_s10, 128, %s948_s29, %s369_s6  }
 0x284 PF: > { %s394_s22 = sand.u32 1, %s724_s12   ;;  %p1018_p12 = scmp.ne.s32.totalorder %s1008_s23, 0 }
 0x285   : > { %p1019_p11 = scmp.ge.s32.totalorder %s744_s17, 2  ;;  %s395_s24 = scalar_lea.sflag [#allocation6], %s394_s22 }
 0x287   : > { %p520_p0 = pnand %p1019_p11, %p1018_p12 }
 0x289   : > { %719 = dma.done.wait (!%p520_p0), %s395_s24, 128  }
 0x28a   : > { %721 = vsyncadd (!%p520_p0), %s395_s24, 4294967168  ;;  %s20_s17 = sadd.s32 1, %s744_s17   ;;  %s1020_s12 = smov %s728_s13 }
 0x28b   : > { %p17_p5 = scmp.ge.s32.totalorder %s20_s17, 4   ;;  %s1021_s13 = smov %s732_s14 }
 0x28c   : > { %s1022_s14 = smov %s879_s5  ;;  %s1023_s15 = smov %s740_s16 }
 0x28d   : > { %s1024_s16 = smov %s1026_s28  ;;  %19 = sbr.rel (!%p17_p5) target bundleno = 7 (0x7), region = 90 }
 0x294   :  { %400 = vsyncpa [#allocation5], 1 }
 0x295   :  { %402 = vsyncpa [#allocation5 + $0x1], 1 }
 0x296   :  { %403 = vsyncpa [#allocation8], 1 }
 0x297   :  { %404 = vsyncpa [#allocation6], 1 }
 0x298   :  { %406 = vsyncpa [#allocation6 + $0x1], 1 }

</bundles_post_ra>
